<compile_context>
chip_gen: v7x
topology: tpu7x:2x2x1
jax: 0.10.0
libtpu: 0.0.40
codegen_flags: <defaults>
</compile_context>

<pallas_src>
import functools

import jax
import jax.numpy as jnp
from jax.experimental import pallas as pl
from jax.experimental.pallas import tpu as pltpu

NUM_BOND_TYPE = 6
NUM_BOND_DIRECTION = 3
NUM_FEAT = NUM_BOND_TYPE + NUM_BOND_DIRECTION  # 9


def _round_up(x, m):
    return ((x + m - 1) // m) * m


# ----------------------------- Pallas kernels ------------------------------ #

def _embed_index_kernel(idx_ref, table_ref, out_ref):
    """Index branch: packed int32 (TE,1) -> summed embedding rows (TE, emb_pad).

    packed = bond_type * 16 + bond_dir.  Uses 9 VPU select-accumulates against the
    VMEM-resident table instead of a lane-sparse one-hot + K=9 MXU matmul.
    """
    packed = idx_ref[...]                       # (TE, 1) int32
    bond_type = packed >> 4                     # (TE, 1)
    bond_dir = packed & 0xF                     # (TE, 1)

    acc = jnp.zeros(out_ref.shape, jnp.float32)
    for c in range(NUM_BOND_TYPE):
        acc += jnp.where(bond_type == c, table_ref[c:c + 1, :], 0.0)
    for c in range(NUM_BOND_DIRECTION):
        acc += jnp.where(bond_dir == c,
                         table_ref[NUM_BOND_TYPE + c:NUM_BOND_TYPE + c + 1, :], 0.0)
    out_ref[...] = acc.astype(out_ref.dtype)


def _linear_kernel(x_ref, table_ref, out_ref):
    """Dense branch: (TE,9) float @ table(9,emb_pad) == nn.Linear(9, emb_dim, bias=False)."""
    out_ref[...] = jnp.dot(
        x_ref[...], table_ref[...], preferred_element_type=jnp.float32
    ).astype(out_ref.dtype)


# ------------------------------- wrappers ----------------------------------- #

def prepare_table(weight):
    """weight: (emb_dim, 9) torch-Linear layout -> lane-dense (9, emb_pad) f32 table.

    Call ONCE per parameter set (hoisted out of the forward path).
    """
    emb_dim = weight.shape[0]
    emb_pad = _round_up(emb_dim, 128)
    table = weight.T.astype(jnp.float32)                 # (9, emb_dim)
    if emb_pad > emb_dim:
        table = jnp.pad(table, ((0, 0), (0, emb_pad - emb_dim)))
    return table                                         # (9, emb_pad)


@functools.partial(jax.jit, static_argnames=("emb_dim", "tile_e", "out_dtype"))
def mixed_bond_encoder(edge_attr, table, *, emb_dim, tile_e=1024,
                       out_dtype=jnp.float32):
    """Forward pass.  table comes from prepare_table(weight); emb_dim is the true dim."""
    E = edge_attr.shape[0]
    emb_pad = table.shape[1]

    # Edge-tile size: multiple of 8, capped so 2x(TE x emb_pad) f32 double-buffered
    # output stays comfortably inside scoped VMEM on every TPU generation.
    TE = min(_round_up(tile_e, 8), _round_up(max(E, 1), 8))
    E_pad = _round_up(max(E, 1), TE)
    grid = (E_pad // TE,)

    if edge_attr.shape[1] == 2:
        # Pack (bond_type, bond_dir) into a single int32 per edge (lane-dense-ish load,
        # no strided lane slices in-kernel).  bond_dir < 3 < 16 so 4 bits suffice.
        idx = edge_attr.astype(jnp.int32)
        packed = (idx[:, 0:1] << 4) | idx[:, 1:2]        # (E, 1)
        x = jnp.pad(packed, ((0, E_pad - E), (0, 0)))    # pad rows = index 0 (valid)
        kernel = _embed_index_kernel
        in_spec = pl.BlockSpec((TE, 1), lambda i: (i, 0))
    else:
        xf = edge_attr.astype(jnp.float32)
        x = jnp.pad(xf, ((0, E_pad - E), (0, 0)))
        kernel = _linear_kernel
        in_spec = pl.BlockSpec((TE, NUM_FEAT), lambda i: (i, 0))

    out = pl.pallas_call(
        kernel,
        out_shape=jax.ShapeDtypeStruct((E_pad, emb_pad), out_dtype),
        grid=grid,
        in_specs=[
            in_spec,
            pl.BlockSpec((NUM_FEAT, emb_pad), lambda i: (0, 0)),  # table VMEM-resident
        ],
        out_specs=pl.BlockSpec((TE, emb_pad), lambda i: (i, 0)),
        compiler_params=pltpu.CompilerParams(
            dimension_semantics=("parallel",)),
    )(x, table)

    return out[:E, :emb_dim]


# ------------------------- deterministic parameters ------------------------- #

def init_weight(key, emb_dim):
    """Match the module's xavier_uniform init on the two column slices of W."""
    k1, k2 = jax.random.split(key)
    b1 = (6.0 / (emb_dim + NUM_BOND_TYPE)) ** 0.5
    w_type = jax.random.uniform(
        k1, (emb_dim, NUM_BOND_TYPE), jnp.float32, minval=-b1, maxval=b1)
    b2 = (6.0 / (emb_dim + NUM_BOND_DIRECTION)) ** 0.5
    w_dir = jax.random.uniform(
        k2, (emb_dim, NUM_BOND_DIRECTION), jnp.float32, minval=-b2, maxval=b2)
    return jnp.concatenate([w_type, w_dir], axis=1)      # (emb_dim, 9)


# --------------------------------- main ------------------------------------- #

if __name__ == "__main__":
    key = jax.random.PRNGKey(0)
    k_w, k_idx, k_dense = jax.random.split(key, 3)

    emb_dim = 32
    E = 50                                               # not a multiple of 8: exercises padding

    weight = init_weight(k_w, emb_dim)                   # (emb_dim, 9)
    table = prepare_table(weight)                        # (9, 128) lane-dense, prepared once

    # Branch 1: integer index edge attributes (E, 2)
    bond_type = jax.random.randint(k_idx, (E, 1), 0, NUM_BOND_TYPE)
    bond_dir = jax.random.randint(jax.random.fold_in(k_idx, 1), (E, 1), 0,
                                  NUM_BOND_DIRECTION)
    edge_attr_idx = jnp.concatenate([bond_type, bond_dir], axis=1).astype(jnp.int32)

    out_idx = mixed_bond_encoder(edge_attr_idx, table, emb_dim=emb_dim)
    jax.block_until_ready(out_idx)

    tbl = weight.T
    ref_idx = (jnp.take(tbl[:NUM_BOND_TYPE], edge_attr_idx[:, 0], axis=0)
               + jnp.take(tbl[NUM_BOND_TYPE:], edge_attr_idx[:, 1], axis=0))
    assert out_idx.shape == (E, emb_dim)
    assert jnp.allclose(out_idx, ref_idx, atol=1e-5), "index branch mismatch"

    # Branch 2: dense edge attributes (E, 9) -> linear
    edge_attr_dense = jax.random.normal(k_dense, (E, NUM_FEAT), jnp.float32)
    out_dense = mixed_bond_encoder(edge_attr_dense, table, emb_dim=emb_dim)
    jax.block_until_ready(out_dense)

    ref_dense = edge_attr_dense @ weight.T
    assert out_dense.shape == (E, emb_dim)
    assert jnp.allclose(out_dense, ref_dense, atol=1e-5), "linear branch mismatch"

    print("KERNEL_OK")
</pallas_src>

<mosaic_0001>
module attributes {stable_mosaic.version = 11 : i64} {
  func.func @_embed_index_kernel(%arg0: i32, %arg1: memref<56x1xi32, #tpu.memory_space<vmem>>, %arg2: memref<9x128xf32, #tpu.memory_space<vmem>>, %arg3: memref<56x128xf32, #tpu.memory_space<vmem>>) attributes {dimension_semantics = [#tpu.dimension_semantics<parallel>], iteration_bounds = array<i64: 1>, scalar_prefetch = 0 : i64, scratch_operands = 0 : i64, tpu.core_type = #tpu.core_type<tc>, window_params = [{transform_indices = @transform_0, window_bounds = array<i64: 56, 1>}, {pipeline_mode = #tpu.pipeline_mode<synchronous>, transform_indices = @transform_1, window_bounds = array<i64: 9, 128>}, {transform_indices = @transform_2, window_bounds = array<i64: 56, 128>}]} {
    %c0 = arith.constant 0 : index
    %c0_0 = arith.constant 0 : index
    %0 = vector.load %arg1[%c0, %c0_0] : memref<56x1xi32, #tpu.memory_space<vmem>>, vector<56x1xi32>
    %c4_i32 = arith.constant 4 : i32
    %1 = vector.broadcast %c4_i32 : i32 to vector<56x1xi32>
    %2 = arith.shrsi %0, %1 : vector<56x1xi32>
    %c15_i32 = arith.constant 15 : i32
    %3 = vector.broadcast %c15_i32 : i32 to vector<56x1xi32>
    %4 = arith.andi %0, %3 : vector<56x1xi32>
    %cst = arith.constant 0.000000e+00 : f32
    %5 = vector.broadcast %cst : f32 to vector<56x128xf32>
    %c0_i32 = arith.constant 0 : i32
    %6 = vector.broadcast %c0_i32 : i32 to vector<56x1xi32>
    %7 = arith.cmpi eq, %2, %6 : vector<56x1xi32>
    %c0_1 = arith.constant 0 : index
    %c0_2 = arith.constant 0 : index
    %8 = vector.load %arg2[%c0_1, %c0_2] : memref<9x128xf32, #tpu.memory_space<vmem>>, vector<1x128xf32>
    %cst_3 = arith.constant 0.000000e+00 : f32
    %9 = vector.shape_cast %7 : vector<56x1xi1> to vector<56x1xi1>
    %10 = vector.broadcast %9 : vector<56x1xi1> to vector<56x128xi1>
    %11 = vector.shape_cast %8 : vector<1x128xf32> to vector<1x128xf32>
    %12 = vector.broadcast %11 : vector<1x128xf32> to vector<56x128xf32>
    %13 = vector.broadcast %cst_3 : f32 to vector<56x128xf32>
    %14 = arith.select %10, %12, %13 : vector<56x128xi1>, vector<56x128xf32>
    %15 = arith.addf %5, %14 : vector<56x128xf32>
    %c1_i32 = arith.constant 1 : i32
    %16 = vector.broadcast %c1_i32 : i32 to vector<56x1xi32>
    %17 = arith.cmpi eq, %2, %16 : vector<56x1xi32>
    %c1 = arith.constant 1 : index
    %c0_4 = arith.constant 0 : index
    %18 = vector.load %arg2[%c1, %c0_4] : memref<9x128xf32, #tpu.memory_space<vmem>>, vector<1x128xf32>
    %cst_5 = arith.constant 0.000000e+00 : f32
    %19 = vector.shape_cast %17 : vector<56x1xi1> to vector<56x1xi1>
    %20 = vector.broadcast %19 : vector<56x1xi1> to vector<56x128xi1>
    %21 = vector.shape_cast %18 : vector<1x128xf32> to vector<1x128xf32>
    %22 = vector.broadcast %21 : vector<1x128xf32> to vector<56x128xf32>
    %23 = vector.broadcast %cst_5 : f32 to vector<56x128xf32>
    %24 = arith.select %20, %22, %23 : vector<56x128xi1>, vector<56x128xf32>
    %25 = arith.addf %15, %24 : vector<56x128xf32>
    %c2_i32 = arith.constant 2 : i32
    %26 = vector.broadcast %c2_i32 : i32 to vector<56x1xi32>
    %27 = arith.cmpi eq, %2, %26 : vector<56x1xi32>
    %c2 = arith.constant 2 : index
    %c0_6 = arith.constant 0 : index
    %28 = vector.load %arg2[%c2, %c0_6] : memref<9x128xf32, #tpu.memory_space<vmem>>, vector<1x128xf32>
    %cst_7 = arith.constant 0.000000e+00 : f32
    %29 = vector.shape_cast %27 : vector<56x1xi1> to vector<56x1xi1>
    %30 = vector.broadcast %29 : vector<56x1xi1> to vector<56x128xi1>
    %31 = vector.shape_cast %28 : vector<1x128xf32> to vector<1x128xf32>
    %32 = vector.broadcast %31 : vector<1x128xf32> to vector<56x128xf32>
    %33 = vector.broadcast %cst_7 : f32 to vector<56x128xf32>
    %34 = arith.select %30, %32, %33 : vector<56x128xi1>, vector<56x128xf32>
    %35 = arith.addf %25, %34 : vector<56x128xf32>
    %c3_i32 = arith.constant 3 : i32
    %36 = vector.broadcast %c3_i32 : i32 to vector<56x1xi32>
    %37 = arith.cmpi eq, %2, %36 : vector<56x1xi32>
    %c3 = arith.constant 3 : index
    %c0_8 = arith.constant 0 : index
    %38 = vector.load %arg2[%c3, %c0_8] : memref<9x128xf32, #tpu.memory_space<vmem>>, vector<1x128xf32>
    %cst_9 = arith.constant 0.000000e+00 : f32
    %39 = vector.shape_cast %37 : vector<56x1xi1> to vector<56x1xi1>
    %40 = vector.broadcast %39 : vector<56x1xi1> to vector<56x128xi1>
    %41 = vector.shape_cast %38 : vector<1x128xf32> to vector<1x128xf32>
    %42 = vector.broadcast %41 : vector<1x128xf32> to vector<56x128xf32>
    %43 = vector.broadcast %cst_9 : f32 to vector<56x128xf32>
    %44 = arith.select %40, %42, %43 : vector<56x128xi1>, vector<56x128xf32>
    %45 = arith.addf %35, %44 : vector<56x128xf32>
    %c4_i32_10 = arith.constant 4 : i32
    %46 = vector.broadcast %c4_i32_10 : i32 to vector<56x1xi32>
    %47 = arith.cmpi eq, %2, %46 : vector<56x1xi32>
    %c4 = arith.constant 4 : index
    %c0_11 = arith.constant 0 : index
    %48 = vector.load %arg2[%c4, %c0_11] : memref<9x128xf32, #tpu.memory_space<vmem>>, vector<1x128xf32>
    %cst_12 = arith.constant 0.000000e+00 : f32
    %49 = vector.shape_cast %47 : vector<56x1xi1> to vector<56x1xi1>
    %50 = vector.broadcast %49 : vector<56x1xi1> to vector<56x128xi1>
    %51 = vector.shape_cast %48 : vector<1x128xf32> to vector<1x128xf32>
    %52 = vector.broadcast %51 : vector<1x128xf32> to vector<56x128xf32>
    %53 = vector.broadcast %cst_12 : f32 to vector<56x128xf32>
    %54 = arith.select %50, %52, %53 : vector<56x128xi1>, vector<56x128xf32>
    %55 = arith.addf %45, %54 : vector<56x128xf32>
    %c5_i32 = arith.constant 5 : i32
    %56 = vector.broadcast %c5_i32 : i32 to vector<56x1xi32>
    %57 = arith.cmpi eq, %2, %56 : vector<56x1xi32>
    %c5 = arith.constant 5 : index
    %c0_13 = arith.constant 0 : index
    %58 = vector.load %arg2[%c5, %c0_13] : memref<9x128xf32, #tpu.memory_space<vmem>>, vector<1x128xf32>
    %cst_14 = arith.constant 0.000000e+00 : f32
    %59 = vector.shape_cast %57 : vector<56x1xi1> to vector<56x1xi1>
    %60 = vector.broadcast %59 : vector<56x1xi1> to vector<56x128xi1>
    %61 = vector.shape_cast %58 : vector<1x128xf32> to vector<1x128xf32>
    %62 = vector.broadcast %61 : vector<1x128xf32> to vector<56x128xf32>
    %63 = vector.broadcast %cst_14 : f32 to vector<56x128xf32>
    %64 = arith.select %60, %62, %63 : vector<56x128xi1>, vector<56x128xf32>
    %65 = arith.addf %55, %64 : vector<56x128xf32>
    %c0_i32_15 = arith.constant 0 : i32
    %66 = vector.broadcast %c0_i32_15 : i32 to vector<56x1xi32>
    %67 = arith.cmpi eq, %4, %66 : vector<56x1xi32>
    %c6 = arith.constant 6 : index
    %c0_16 = arith.constant 0 : index
    %68 = vector.load %arg2[%c6, %c0_16] : memref<9x128xf32, #tpu.memory_space<vmem>>, vector<1x128xf32>
    %cst_17 = arith.constant 0.000000e+00 : f32
    %69 = vector.shape_cast %67 : vector<56x1xi1> to vector<56x1xi1>
    %70 = vector.broadcast %69 : vector<56x1xi1> to vector<56x128xi1>
    %71 = vector.shape_cast %68 : vector<1x128xf32> to vector<1x128xf32>
    %72 = vector.broadcast %71 : vector<1x128xf32> to vector<56x128xf32>
    %73 = vector.broadcast %cst_17 : f32 to vector<56x128xf32>
    %74 = arith.select %70, %72, %73 : vector<56x128xi1>, vector<56x128xf32>
    %75 = arith.addf %65, %74 : vector<56x128xf32>
    %c1_i32_18 = arith.constant 1 : i32
    %76 = vector.broadcast %c1_i32_18 : i32 to vector<56x1xi32>
    %77 = arith.cmpi eq, %4, %76 : vector<56x1xi32>
    %c7 = arith.constant 7 : index
    %c0_19 = arith.constant 0 : index
    %78 = vector.load %arg2[%c7, %c0_19] : memref<9x128xf32, #tpu.memory_space<vmem>>, vector<1x128xf32>
    %cst_20 = arith.constant 0.000000e+00 : f32
    %79 = vector.shape_cast %77 : vector<56x1xi1> to vector<56x1xi1>
    %80 = vector.broadcast %79 : vector<56x1xi1> to vector<56x128xi1>
    %81 = vector.shape_cast %78 : vector<1x128xf32> to vector<1x128xf32>
    %82 = vector.broadcast %81 : vector<1x128xf32> to vector<56x128xf32>
    %83 = vector.broadcast %cst_20 : f32 to vector<56x128xf32>
    %84 = arith.select %80, %82, %83 : vector<56x128xi1>, vector<56x128xf32>
    %85 = arith.addf %75, %84 : vector<56x128xf32>
    %c2_i32_21 = arith.constant 2 : i32
    %86 = vector.broadcast %c2_i32_21 : i32 to vector<56x1xi32>
    %87 = arith.cmpi eq, %4, %86 : vector<56x1xi32>
    %c8 = arith.constant 8 : index
    %c0_22 = arith.constant 0 : index
    %88 = vector.load %arg2[%c8, %c0_22] : memref<9x128xf32, #tpu.memory_space<vmem>>, vector<1x128xf32>
    %cst_23 = arith.constant 0.000000e+00 : f32
    %89 = vector.shape_cast %87 : vector<56x1xi1> to vector<56x1xi1>
    %90 = vector.broadcast %89 : vector<56x1xi1> to vector<56x128xi1>
    %91 = vector.shape_cast %88 : vector<1x128xf32> to vector<1x128xf32>
    %92 = vector.broadcast %91 : vector<1x128xf32> to vector<56x128xf32>
    %93 = vector.broadcast %cst_23 : f32 to vector<56x128xf32>
    %94 = arith.select %90, %92, %93 : vector<56x128xi1>, vector<56x128xf32>
    %95 = arith.addf %85, %94 : vector<56x128xf32>
    %c0_24 = arith.constant 0 : index
    %c0_25 = arith.constant 0 : index
    %96 = vector.load %arg3[%c0_24, %c0_25] : memref<56x128xf32, #tpu.memory_space<vmem>>, vector<56x128xf32>
    tpu.vector_store %arg3[%c0_24, %c0_25], %95 {strides = array<i32>} : memref<56x128xf32, #tpu.memory_space<vmem>>, vector<56x128xf32>,
    return
  }
  func.func @transform_0(%arg0: i32) -> (i32, i32) {
    %c0_i32 = arith.constant 0 : i32
    %c0_i32_0 = arith.constant 0 : i32
    return %arg0, %c0_i32 : i32, i32
  }
  func.func @transform_1(%arg0: i32) -> (i32, i32) {
    %c0_i32 = arith.constant 0 : i32
    %c0_i32_0 = arith.constant 0 : i32
    %c0_i32_1 = arith.constant 0 : i32
    return %c0_i32, %c0_i32_0 : i32, i32
  }
  func.func @transform_2(%arg0: i32) -> (i32, i32) {
    %c0_i32 = arith.constant 0 : i32
    %c0_i32_0 = arith.constant 0 : i32
    return %arg0, %c0_i32 : i32, i32
  }
}

</mosaic_0001>

<bundles_post_ra>
// kernel: mixed_bond_encoder.1
= control target key start
LH: loop header
LB: loop body
LE: loop exit
PB: predicated region body
PF: predicated region fallthrough
CT: control target
= control target key end

     0   :  { %v604_v0 = vmov 0   ;;  %s1035_s0 = inlined_call_operand.vmem [shape: s32[56,1], index: 0, kind: input, shape index: {}]   ;;  %s1036_s1 = inlined_call_operand.vmem [shape: f32[9,128], index: 1, kind: input, shape index: {}]   ;;  %s1037_s2 = inlined_call_operand.vmem [shape: f32[56,128], index: 2, kind: output, shape index: {}]  }
   0x1   :  { %603 = vset.pattern.permute.xlu1 %v604_v0  ;;  %602 = vset.pattern.permute.xlu0 %v604_v0  ;;  %v625_v1 = vld [vmem:[%s1035_s0 + $0x10] sm:$0xff]  ;;  %v630_v2 = vld [vmem:[%s1035_s0] sm:$0xff]  ;;  %v635_v3 = vld [vmem:[%s1035_s0 + $0x18] sm:$0xff] }
   0x2   :  { %v638_v4 = vshra.s32 %v625_v1, 4  ;;  %v641_v5 = vshra.s32 %v630_v2, 4  ;;  %v644_v6 = vshra.s32 %v635_v3, 4  ;;  %v12_v7 = vld [vmem:[%s1035_s0 + $0x8] sm:$0xff]  ;;  %v657_v9 = vld [vmem:[%s1035_s0 + $0x20] sm:$0xff]  ;;  %v676_v15 = vld [vmem:[%s1035_s0 + $0x30] sm:$0xff] }
   0x3   :  { %v652_v8 = vld [vmem:[%s1035_s0 + $0x28] sm:$0xff]  ;;  %v659_v10 = vshra.s32 %v12_v7, 4  ;;  %v668_v12 = vshra.s32 %v657_v9, 4  ;;  %v683_v18 = vshra.s32 %v676_v15, 4  ;;  %v700_v23 = vand.u32 15, %v12_v7 }
   0x4   :  { %v662_v11 = vshra.s32 %v652_v8, 4  ;;  %vm34_vm0 = vcmp.eq.s32.totalorder %v638_v4, 0  ;;  %vm32_vm1 = vcmp.eq.s32.totalorder %v641_v5, 0  ;;  %vm35_vm2 = vcmp.eq.s32.totalorder %v644_v6, 0 }
   0x5   :  { %v42_v13 = vsel %vm34_vm0, 1, %v604_v0  ;;  %v40_v14 = vsel %vm32_vm1, 1, %v604_v0  ;;  %vm33_vm3 = vcmp.eq.s32.totalorder %v659_v10, 0  ;;  %v43_v16 = vsel %vm35_vm2, 1, %v604_v0 }
   0x6   :  { %54 = vperm.xlu1 %603, %v42_v13   ;;  %48 = vperm.xlu0 %602, %v40_v14   ;;  %v41_v17 = vsel %vm33_vm3, 1, %v604_v0  ;;  %vm37_vm4 = vcmp.eq.s32.totalorder %v662_v11, 0  ;;  %vm36_vm5 = vcmp.eq.s32.totalorder %v668_v12, 0  ;;  %vm93_vm6 = vcmp.eq.s32.totalorder %v641_v5, 1 }
   0x7   :  { %v45_v19 = vsel %vm37_vm4, 1, %v604_v0  ;;  %v44_v20 = vsel %vm36_vm5, 1, %v604_v0  ;;  %vm38_vm7 = vcmp.eq.s32.totalorder %v683_v18, 0  ;;  %v101_v21 = vsel %vm93_vm6, 1, %v604_v0 }
   0x8   :  { %v46_v22 = vsel %vm38_vm7, 1, %v604_v0  ;;  %vm95_vm8 = vcmp.eq.s32.totalorder %v638_v4, 1  ;;  %vm94_vm9 = vcmp.eq.s32.totalorder %v659_v10, 1  ;;  %vm97_vm10 = vcmp.eq.s32.totalorder %v668_v12, 1 }
   0x9   :  { %vm96_vm11 = vcmp.eq.s32.totalorder %v644_v6, 1  ;;  %vm99_vm12 = vcmp.eq.s32.totalorder %v683_v18, 1  ;;  %vm98_vm13 = vcmp.eq.s32.totalorder %v662_v11, 1  ;;  %vm155_vm14 = vcmp.eq.s32.totalorder %v659_v10, 2 }
   0xa   :  { %57 = vperm.xlu1 %603, %v43_v16   ;;  %51 = vperm.xlu0 %602, %v41_v17   ;;  %vm154_vm15 = vcmp.eq.s32.totalorder %v641_v5, 2  ;;  %vm157_vm0 = vcmp.eq.s32.totalorder %v644_v6, 2  ;;  %v103_v24 = vsel %vm95_vm8, 1, %v604_v0  ;;  %v102_v25 = vsel %vm94_vm9, 1, %v604_v0 }
   0xb   :  { %v105_v26 = vsel %vm97_vm10, 1, %v604_v0  ;;  %vm156_vm1 = vcmp.eq.s32.totalorder %v638_v4, 2  ;;  %v104_v27 = vsel %vm96_vm11, 1, %v604_v0  ;;  %v107_v28 = vsel %vm99_vm12, 1, %v604_v0 }
   0xc   :  { %v106_v29 = vsel %vm98_vm13, 1, %v604_v0  ;;  %vm337_vm2 = vcmp.eq.s32.totalorder %v641_v5, 5  ;;  %v163_v30 = vsel %vm155_vm14, 1, %v604_v0  ;;  %v162_v31 = vsel %vm154_vm15, 1, %v604_v0 }
   0xd   :  { %v713_v32 = vsel %vm157_vm0, 1, %v604_v0  ;;  %v716_v33 = vsel %vm337_vm2, 1, %v604_v0  ;;  %v719_v34 = vsel %vm156_vm1, 1, %v604_v0  ;;  %vm339_vm3 = vcmp.eq.s32.totalorder %v638_v4, 5 }
   0xe   :  { %63 = vperm.xlu1 %603, %v45_v19   ;;  %60 = vperm.xlu0 %602, %v44_v20   ;;  %vm338_vm4 = vcmp.eq.s32.totalorder %v659_v10, 5  ;;  %vm341_vm5 = vcmp.eq.s32.totalorder %v668_v12, 5  ;;  %v725_v35 = vsel %vm339_vm3, 1, %v604_v0  ;;  %vm340_vm6 = vcmp.eq.s32.totalorder %v644_v6, 5 }
   0xf   :  { %v728_v36 = vsel %vm338_vm4, 1, %v604_v0  ;;  %v731_v37 = vsel %vm341_vm5, 1, %v604_v0  ;;  %v735_v38 = vsel %vm340_vm6, 1, %v604_v0  ;;  %vm343_vm7 = vcmp.eq.s32.totalorder %v683_v18, 5 }
  0x10   :  { %vm342_vm8 = vcmp.eq.s32.totalorder %v662_v11, 5  ;;  %vm399_vm9 = vcmp.eq.s32.totalorder %v700_v23, 0  ;;  %v741_v39 = vsel %vm343_vm7, 1, %v604_v0  ;;  %v25_v42 = vand.u32 15, %v630_v2 }
  0x11   :  { %v744_v40 = vsel %vm342_vm8, 1, %v604_v0  ;;  %v747_v41 = vsel %vm399_vm9, 1, %v604_v0  ;;  %v28_v43 = vand.u32 15, %v635_v3  ;;  %v27_v44 = vand.u32 15, %v625_v1 }
  0x12   :  { %109 = vperm.xlu1 %603, %v101_v21   ;;  %66 = vperm.xlu0 %602, %v46_v22   ;;  %v30_v45 = vand.u32 15, %v652_v8  ;;  %v29_v46 = vand.u32 15, %v657_v9  ;;  %vm398_vm10 = vcmp.eq.s32.totalorder %v25_v42, 0  ;;  %vm459_vm11 = vcmp.eq.s32.totalorder %v25_v42, 1 }
  0x13   :  { %v31_v47 = vand.u32 15, %v676_v15  ;;  %vm460_vm12 = vcmp.eq.s32.totalorder %v700_v23, 1  ;;  %vm159_vm13 = vcmp.eq.s32.totalorder %v662_v11, 2  ;;  %v758_v48 = vsel %vm398_vm10, 1, %v604_v0 }
  0x14   :  { %vm401_vm14 = vcmp.eq.s32.totalorder %v28_v43, 0  ;;  %vm400_vm15 = vcmp.eq.s32.totalorder %v27_v44, 0  ;;  %vm403_vm0 = vcmp.eq.s32.totalorder %v30_v45, 0  ;;  %vm402_vm1 = vcmp.eq.s32.totalorder %v29_v46, 0 }
  0x15   :  { %v761_v49 = vsel %vm401_vm14, 1, %v604_v0  ;;  %v764_v50 = vsel %vm400_vm15, 1, %v604_v0  ;;  %v767_v51 = vsel %vm403_vm0, 1, %v604_v0  ;;  %v770_v52 = vsel %vm402_vm1, 1, %v604_v0 }
  0x16   :  { %115 = vperm.xlu1 %603, %v103_v24   ;;  %112 = vperm.xlu0 %602, %v102_v25   ;;  %v773_v53 = vsel %vm459_vm11, 1, %v604_v0  ;;  %vm404_vm2 = vcmp.eq.s32.totalorder %v31_v47, 0  ;;  %vm461_vm3 = vcmp.eq.s32.totalorder %v27_v44, 1  ;;  %v784_v56 = vsel %vm460_vm12, 1, %v604_v0 }
  0x17   :  { %v776_v54 = vsel %vm404_vm2, 1, %v604_v0  ;;  %v779_v55 = vsel %vm461_vm3, 1, %v604_v0  ;;  %vm463_vm4 = vcmp.eq.s32.totalorder %v29_v46, 1  ;;  %vm462_vm5 = vcmp.eq.s32.totalorder %v28_v43, 1 }
  0x18   :  { %v787_v57 = vsel %vm463_vm4, 1, %v604_v0  ;;  %vm465_vm6 = vcmp.eq.s32.totalorder %v31_v47, 1  ;;  %vm464_vm7 = vcmp.eq.s32.totalorder %v30_v45, 1  ;;  %v790_v58 = vsel %vm462_vm5, 1, %v604_v0 }
  0x19   :  { %v793_v59 = vsel %vm465_vm6, 1, %v604_v0  ;;  %v796_v60 = vsel %vm464_vm7, 1, %v604_v0  ;;  %vm521_vm8 = vcmp.eq.s32.totalorder %v700_v23, 2  ;;  %vm520_vm9 = vcmp.eq.s32.totalorder %v25_v42, 2 }
  0x1a   :  { %121 = vperm.xlu1 %603, %v105_v26   ;;  %118 = vperm.xlu0 %602, %v104_v27   ;;  %v800_v61 = vsel %vm521_vm8, 1, %v604_v0  ;;  %vm523_vm10 = vcmp.eq.s32.totalorder %v28_v43, 2  ;;  %vm522_vm11 = vcmp.eq.s32.totalorder %v27_v44, 2  ;;  %v803_v62 = vsel %vm520_vm9, 1, %v604_v0  ;;  %v592_v27 = vld [vmem:[%s1036_s1] ss:$0 sm:$0xff] }
  0x1b   :  { %v806_v63 = vsel %vm523_vm10, 1, %v604_v0  ;;  %v809_v1 = vsel %vm522_vm11, 1, %v604_v0  ;;  %vm525_vm12 = vcmp.eq.s32.totalorder %v30_v45, 2  ;;  %vm158_vm14 = vcmp.eq.s32.totalorder %v668_v12, 2 }
  0x1c   :  { %v813_v2 = vsel %vm525_vm12, 1, %v604_v0  ;;  %vm524_vm15 = vcmp.eq.s32.totalorder %v29_v46, 2  ;;  %vm526_vm0 = vcmp.eq.s32.totalorder %v31_v47, 2  ;;  %v167_v8 = vsel %vm159_vm13, 1, %v604_v0 }
  0x1d   :  { %v816_v3 = vsel %vm524_vm15, 1, %v604_v0  ;;  %v819_v7 = vsel %vm526_vm0, 1, %v604_v0  ;;  %v166_v9 = vsel %vm158_vm14, 1, %v604_v0  ;;  %vm215_vm1 = vcmp.eq.s32.totalorder %v641_v5, 3 }
  0x1e   :  { %127 = vperm.xlu1 %603, %v107_v28   ;;  %124 = vperm.xlu0 %602, %v106_v29   ;;  %vm160_vm2 = vcmp.eq.s32.totalorder %v683_v18, 2  ;;  %v223_v13 = vsel %vm215_vm1, 1, %v604_v0  ;;  %vm217_vm3 = vcmp.eq.s32.totalorder %v638_v4, 3  ;;  %vm216_vm4 = vcmp.eq.s32.totalorder %v659_v10, 3  ;;  %v593_v28 = vld [vmem:[%s1036_s1 + $0x1] ss:$0 sm:$0xff] }
  0x1f   :  { %v168_v14 = vsel %vm160_vm2, 1, %v604_v0  ;;  %v225_v15 = vsel %vm217_vm3, 1, %v604_v0  ;;  %v224_v16 = vsel %vm216_vm4, 1, %v604_v0  ;;  %vm219_vm13 = vcmp.eq.s32.totalorder %v668_v12, 3 }
  0x20   :  { %vm218_vm5 = vcmp.eq.s32.totalorder %v644_v6, 3  ;;  %v227_v17 = vsel %vm219_vm13, 1, %v604_v0  ;;  %vm221_vm6 = vcmp.eq.s32.totalorder %v683_v18, 3  ;;  %vm220_vm7 = vcmp.eq.s32.totalorder %v662_v11, 3 }
  0x21   :  { %v226_v19 = vsel %vm218_vm5, 1, %v604_v0  ;;  %v229_v20 = vsel %vm221_vm6, 1, %v604_v0  ;;  %v228_v21 = vsel %vm220_vm7, 1, %v604_v0  ;;  %vm277_vm8 = vcmp.eq.s32.totalorder %v659_v10, 4 }
  0x22   :  { %173 = vperm.xlu1 %603, %v163_v30   ;;  %170 = vperm.xlu0 %602, %v162_v31   ;;  %vm276_vm9 = vcmp.eq.s32.totalorder %v641_v5, 4  ;;  %v285_v22 = vsel %vm277_vm8, 1, %v604_v0  ;;  %vm279_vm10 = vcmp.eq.s32.totalorder %v644_v6, 4  ;;  %vm278_vm11 = vcmp.eq.s32.totalorder %v638_v4, 4 }
  0x23   :  { %v284_v23 = vsel %vm276_vm9, 1, %v604_v0  ;;  %v287_v24 = vsel %vm279_vm10, 1, %v604_v0  ;;  %v286_v25 = vsel %vm278_vm11, 1, %v604_v0  ;;  %vm281_vm12 = vcmp.eq.s32.totalorder %v662_v11, 4 }
  0x24   :  { %vm280_vm14 = vcmp.eq.s32.totalorder %v668_v12, 4  ;;  %v289_v5 = vsel %vm281_vm12, 1, %v604_v0  ;;  %vm282_vm15 = vcmp.eq.s32.totalorder %v683_v18, 4 }
  0x25   :  { %v288_v10 = vsel %vm280_vm14, 1, %v604_v0  ;;  %v290_v4 = vsel %vm282_vm15, 1, %v604_v0 }
  0x26   :  { %179 = vperm.xlu1 %603, %v713_v32   ;;  %176 = vperm.xlu0 %602, %v719_v34  }
  0x2a   :  { %185 = vperm.xlu1 %603, %v167_v8   ;;  %182 = vperm.xlu0 %602, %v166_v9  }
  0x2e   :  { %231 = vperm.xlu1 %603, %v223_v13   ;;  %188 = vperm.xlu0 %602, %v168_v14  }
  0x32   :  { %237 = vperm.xlu1 %603, %v225_v15   ;;  %234 = vperm.xlu0 %602, %v224_v16  }
  0x36   :  { %243 = vperm.xlu1 %603, %v227_v17   ;;  %240 = vperm.xlu0 %602, %v226_v19  }
  0x3a   :  { %249 = vperm.xlu1 %603, %v229_v20   ;;  %246 = vperm.xlu0 %602, %v228_v21  }
  0x3e   :  { %295 = vperm.xlu1 %603, %v285_v22   ;;  %292 = vperm.xlu0 %602, %v284_v23  }
  0x42   :  { %301 = vperm.xlu1 %603, %v287_v24   ;;  %298 = vperm.xlu0 %602, %v286_v25  }
  0x46   :  { %307 = vperm.xlu1 %603, %v289_v5   ;;  %304 = vperm.xlu0 %602, %v288_v10  }
  0x4a   :  { %353 = vperm.xlu1 %603, %v716_v33   ;;  %310 = vperm.xlu0 %602, %v290_v4  }
  0x4e   :  { %359 = vperm.xlu1 %603, %v725_v35   ;;  %356 = vperm.xlu0 %602, %v728_v36  }
  0x52   :  { %365 = vperm.xlu1 %603, %v731_v37   ;;  %362 = vperm.xlu0 %602, %v735_v38  }
  0x56   :  { %371 = vperm.xlu1 %603, %v741_v39   ;;  %368 = vperm.xlu0 %602, %v744_v40  }
  0x5a   :  { %417 = vperm.xlu1 %603, %v747_v41   ;;  %414 = vperm.xlu0 %602, %v758_v48  }
  0x5e   :  { %423 = vperm.xlu1 %603, %v761_v49   ;;  %420 = vperm.xlu0 %602, %v764_v50  }
  0x62   :  { %429 = vperm.xlu1 %603, %v767_v51   ;;  %426 = vperm.xlu0 %602, %v770_v52  }
  0x66   :  { %475 = vperm.xlu1 %603, %v773_v53   ;;  %432 = vperm.xlu0 %602, %v776_v54  }
  0x6a   :  { %481 = vperm.xlu1 %603, %v779_v55   ;;  %478 = vperm.xlu0 %602, %v784_v56  }
  0x6e   :  { %487 = vperm.xlu1 %603, %v787_v57   ;;  %484 = vperm.xlu0 %602, %v790_v58   ;;  %v594_v58 = vld [vmem:[%s1036_s1 + $0x2] ss:$0 sm:$0xff] }
  0x72   :  { %493 = vperm.xlu1 %603, %v793_v59   ;;  %490 = vperm.xlu0 %602, %v796_v60  }
  0x76   :  { %539 = vperm.xlu1 %603, %v800_v61   ;;  %536 = vperm.xlu0 %602, %v803_v62  }
  0x7a   :  { %545 = vperm.xlu1 %603, %v806_v63   ;;  %542 = vperm.xlu0 %602, %v809_v1  }
  0x7e   :  { %551 = vperm.xlu1 %603, %v813_v2   ;;  %548 = vperm.xlu0 %602, %v816_v3  }
  0x82   :  { %554 = vperm.xlu0 %602, %v819_v7  }
  0x85   :  { %v55_v0 = vpop.permute.xlu1 %54  ;;  %v49_v6 = vpop.permute.xlu0 %48 }
  0x86   :  { %vm68_vm0 = vcmp.eq.s32.totalorder %v49_v6, 1  ;;  %vm70_vm2 = vcmp.eq.s32.totalorder %v55_v0, 1 }
  0x87   :  { %v79_v31 = vsel %vm68_vm0, %v592_v27, 0.0  ;;  %v81_v36 = vsel %vm70_vm2, %v592_v27, 0.0 }
  0x89   :  { %v58_v11 = vpop.permute.xlu1 %57  ;;  %v52_v12 = vpop.permute.xlu0 %51 }
  0x8a   :  { %vm69_vm3 = vcmp.eq.s32.totalorder %v52_v12, 1  ;;  %vm71_vm5 = vcmp.eq.s32.totalorder %v58_v11, 1 }
  0x8b   :  { %v80_v37 = vsel %vm69_vm3, %v592_v27, 0.0  ;;  %v82_v44 = vsel %vm71_vm5, %v592_v27, 0.0 }
  0x8d   :  { %v64_v18 = vpop.permute.xlu1 %63  ;;  %v61_v26 = vpop.permute.xlu0 %60 }
  0x8e   :  { %vm72_vm6 = vcmp.eq.s32.totalorder %v61_v26, 1  ;;  %vm73_vm9 = vcmp.eq.s32.totalorder %v64_v18, 1 }
  0x8f   :  { %v83_v45 = vsel %vm72_vm6, %v592_v27, 0.0  ;;  %v84_v52 = vsel %vm73_vm9, %v592_v27, 0.0 }
  0x91   :  { %v110_v29 = vpop.permute.xlu1 %109  ;;  %v67_v30 = vpop.permute.xlu0 %66 }
  0x92   :  { %vm129_vm1 = vcmp.eq.s32.totalorder %v110_v29, 1  ;;  %vm74_vm10 = vcmp.eq.s32.totalorder %v67_v30, 1 }
  0x93   :  { %v140_v32 = vsel %vm129_vm1, %v593_v28, 0.0  ;;  %v85_v53 = vsel %vm74_vm10, %v592_v27, 0.0 }
  0x94   :  { %v147_v33 = vadd.f32 %v140_v32, %v79_v31 }
  0x95   :  { %v116_v34 = vpop.permute.xlu1 %115  ;;  %v113_v35 = vpop.permute.xlu0 %112 }
  0x96   :  { %vm131_vm4 = vcmp.eq.s32.totalorder %v116_v34, 1  ;;  %vm130_vm13 = vcmp.eq.s32.totalorder %v113_v35, 1 }
  0x97   :  { %v142_v38 = vsel %vm131_vm4, %v593_v28, 0.0  ;;  %v141_v39 = vsel %vm130_vm13, %v593_v28, 0.0 }
  0x98   :  { %v149_v40 = vadd.f32 %v142_v38, %v81_v36  ;;  %v148_v41 = vadd.f32 %v141_v39, %v80_v37 }
  0x99   :  { %v122_v42 = vpop.permute.xlu1 %121  ;;  %v119_v43 = vpop.permute.xlu0 %118 }
  0x9a   :  { %vm133_vm7 = vcmp.eq.s32.totalorder %v122_v42, 1  ;;  %vm132_vm8 = vcmp.eq.s32.totalorder %v119_v43, 1 }
  0x9b   :  { %v144_v46 = vsel %vm133_vm7, %v593_v28, 0.0  ;;  %v143_v47 = vsel %vm132_vm8, %v593_v28, 0.0 }
  0x9c   :  { %v151_v48 = vadd.f32 %v144_v46, %v83_v45  ;;  %v150_v49 = vadd.f32 %v143_v47, %v82_v44 }
  0x9d   :  { %v128_v50 = vpop.permute.xlu1 %127  ;;  %v125_v51 = vpop.permute.xlu0 %124 }
  0x9e   :  { %vm135_vm11 = vcmp.eq.s32.totalorder %v128_v50, 1  ;;  %vm134_vm12 = vcmp.eq.s32.totalorder %v125_v51, 1  ;;  %v596_v50 = vld [vmem:[%s1036_s1 + $0x4] ss:$0 sm:$0xff] }
  0x9f   :  { %v146_v54 = vsel %vm135_vm11, %v593_v28, 0.0  ;;  %v145_v55 = vsel %vm134_vm12, %v593_v28, 0.0 }
  0xa0   :  { %v153_v56 = vadd.f32 %v146_v54, %v85_v53  ;;  %v152_v57 = vadd.f32 %v145_v55, %v84_v52 }
  0xa1   :  { %v174_v59 = vpop.permute.xlu1 %173  ;;  %v171_v60 = vpop.permute.xlu0 %170 }
  0xa2   :  { %vm191_vm14 = vcmp.eq.s32.totalorder %v174_v59, 1  ;;  %vm190_vm15 = vcmp.eq.s32.totalorder %v171_v60, 1  ;;  %v940_v59 = vld [vmem:[%s1036_s1 + $0x5] ss:$0 sm:$0xff] }
  0xa3   :  { %v202_v61 = vsel %vm191_vm14, %v594_v58, 0.0  ;;  %v201_v62 = vsel %vm190_vm15, %v594_v58, 0.0 }
  0xa4   :  { %v894_v63 = vadd.f32 %v202_v61, %v148_v41  ;;  %v208_v1 = vadd.f32 %v201_v62, %v147_v33  ;;  %v595_v41 = vld [vmem:[%s1036_s1 + $0x3] ss:$0 sm:$0xff] }
  0xa5   :  { %v180_v2 = vpop.permute.xlu1 %179  ;;  %v177_v3 = vpop.permute.xlu0 %176 }
  0xa6   :  { %vm193_vm0 = vcmp.eq.s32.totalorder %v180_v2, 1  ;;  %vm192_vm1 = vcmp.eq.s32.totalorder %v177_v3, 1 }
  0xa7   :  { %v204_v7 = vsel %vm193_vm0, %v594_v58, 0.0  ;;  %v203_v8 = vsel %vm192_vm1, %v594_v58, 0.0 }
  0xa8   :  { %v896_v9 = vadd.f32 %v204_v7, %v150_v49  ;;  %v210_v13 = vadd.f32 %v203_v8, %v149_v40 }
  0xa9   :  { %v186_v14 = vpop.permute.xlu1 %185  ;;  %v183_v15 = vpop.permute.xlu0 %182 }
  0xaa   :  { %vm195_vm2 = vcmp.eq.s32.totalorder %v186_v14, 1  ;;  %vm194_vm3 = vcmp.eq.s32.totalorder %v183_v15, 1 }
  0xab   :  { %v206_v16 = vsel %vm195_vm2, %v594_v58, 0.0  ;;  %v205_v17 = vsel %vm194_vm3, %v594_v58, 0.0 }
  0xac   :  { %v898_v19 = vadd.f32 %v206_v16, %v152_v57  ;;  %v212_v20 = vadd.f32 %v205_v17, %v151_v48 }
  0xad   :  { %v232_v21 = vpop.permute.xlu1 %231  ;;  %v189_v22 = vpop.permute.xlu0 %188 }
  0xae   :  { %vm196_vm4 = vcmp.eq.s32.totalorder %v189_v22, 1  ;;  %vm251_vm13 = vcmp.eq.s32.totalorder %v232_v21, 1 }
  0xaf   :  { %v207_v23 = vsel %vm196_vm4, %v594_v58, 0.0  ;;  %v262_v42 = vsel %vm251_vm13, %v595_v41, 0.0 }
  0xb0   :  { %v214_v24 = vadd.f32 %v207_v23, %v153_v56  ;;  %v269_v47 = vadd.f32 %v262_v42, %v208_v1 }
  0xb1   :  { %v238_v25 = vpop.permute.xlu1 %237  ;;  %v235_v5 = vpop.permute.xlu0 %234 }
  0xb2   :  { %vm253_vm5 = vcmp.eq.s32.totalorder %v238_v25, 1  ;;  %vm252_vm6 = vcmp.eq.s32.totalorder %v235_v5, 1 }
  0xb3   :  { %v264_v43 = vsel %vm253_vm5, %v595_v41, 0.0  ;;  %v263_v46 = vsel %vm252_vm6, %v595_v41, 0.0 }
  0xb4   :  { %v271_v48 = vadd.f32 %v264_v43, %v210_v13  ;;  %v270_v55 = vadd.f32 %v263_v46, %v894_v63 }
  0xb5   :  { %v244_v10 = vpop.permute.xlu1 %243  ;;  %v241_v4 = vpop.permute.xlu0 %240 }
  0xb6   :  { %vm255_vm7 = vcmp.eq.s32.totalorder %v244_v10, 1  ;;  %vm254_vm8 = vcmp.eq.s32.totalorder %v241_v4, 1  ;;  %v961_v4 = vld [vmem:[%s1036_s1 + $0x6] ss:$0 sm:$0xff] }
  0xb7   :  { %v266_v49 = vsel %vm255_vm7, %v595_v41, 0.0  ;;  %v265_v51 = vsel %vm254_vm8, %v595_v41, 0.0 }
  0xb8   :  { %v273_v57 = vadd.f32 %v266_v49, %v212_v20  ;;  %v272_v60 = vadd.f32 %v265_v51, %v896_v9 }
  0xb9   :  { %v250_v0 = vpop.permute.xlu1 %249  ;;  %v247_v6 = vpop.permute.xlu0 %246 }
  0xba   :  { %vm257_vm9 = vcmp.eq.s32.totalorder %v250_v0, 1  ;;  %vm256_vm10 = vcmp.eq.s32.totalorder %v247_v6, 1 }
  0xbb   :  { %v268_v52 = vsel %vm257_vm9, %v595_v41, 0.0  ;;  %v267_v56 = vsel %vm256_vm10, %v595_v41, 0.0  ;;  %v600_v41 = vld [vmem:[%s1036_s1 + $0x8] ss:$0 sm:$0xff] }
  0xbc   :  { %v275_v61 = vadd.f32 %v268_v52, %v214_v24  ;;  %v274_v2 = vadd.f32 %v267_v56, %v898_v19 }
  0xbd   :  { %v296_v11 = vpop.permute.xlu1 %295  ;;  %v293_v12 = vpop.permute.xlu0 %292 }
  0xbe   :  { %vm313_vm11 = vcmp.eq.s32.totalorder %v296_v11, 1  ;;  %vm312_vm12 = vcmp.eq.s32.totalorder %v293_v12, 1 }
  0xbf   :  { %v324_v58 = vsel %vm313_vm11, %v596_v50, 0.0  ;;  %v323_v62 = vsel %vm312_vm12, %v596_v50, 0.0 }
  0xc0   :  { %v331_v13 = vadd.f32 %v324_v58, %v270_v55  ;;  %v330_v16 = vadd.f32 %v323_v62, %v269_v47 }
  0xc1   :  { %v302_v18 = vpop.permute.xlu1 %301  ;;  %v299_v26 = vpop.permute.xlu0 %298 }
  0xc2   :  { %vm315_vm14 = vcmp.eq.s32.totalorder %v302_v18, 1  ;;  %vm314_vm15 = vcmp.eq.s32.totalorder %v299_v26, 1  ;;  %v974_v18 = vld [vmem:[%s1036_s1 + $0x7] ss:$0 sm:$0xff] }
  0xc3   :  { %v326_v1 = vsel %vm315_vm14, %v596_v50, 0.0  ;;  %v325_v63 = vsel %vm314_vm15, %v596_v50, 0.0 }
  0xc4   :  { %v333_v9 = vadd.f32 %v326_v1, %v272_v60  ;;  %v332_v17 = vadd.f32 %v325_v63, %v271_v48 }
  0xc5   :  { %v308_v27 = vpop.permute.xlu1 %307  ;;  %v305_v28 = vpop.permute.xlu0 %304 }
  0xc6   :  { %vm317_vm0 = vcmp.eq.s32.totalorder %v308_v27, 1  ;;  %vm316_vm1 = vcmp.eq.s32.totalorder %v305_v28, 1 }
  0xc7   :  { %v328_v3 = vsel %vm317_vm0, %v596_v50, 0.0  ;;  %v327_v14 = vsel %vm316_vm1, %v596_v50, 0.0 }
  0xc8   :  { %v335_v19 = vadd.f32 %v328_v3, %v274_v2  ;;  %v334_v21 = vadd.f32 %v327_v14, %v273_v57 }
  0xc9   :  { %v354_v29 = vpop.permute.xlu1 %353  ;;  %v900_v30 = vpop.permute.xlu0 %310 }
  0xca   :  { %vm373_vm2 = vcmp.eq.s32.totalorder %v354_v29, 1  ;;  %vm318_vm3 = vcmp.eq.s32.totalorder %v900_v30, 1 }
  0xcb   :  { %v384_v15 = vsel %vm373_vm2, %v940_v59, 0.0  ;;  %v329_v20 = vsel %vm318_vm3, %v596_v50, 0.0 }
  0xcc   :  { %v391_v22 = vadd.f32 %v384_v15, %v330_v16  ;;  %v965_v0 = vadd.f32 %v329_v20, %v275_v61 }
  0xcd   :  { %v902_v31 = vpop.permute.xlu1 %359  ;;  %v904_v32 = vpop.permute.xlu0 %356 }
  0xce   :  { %vm375_vm4 = vcmp.eq.s32.totalorder %v902_v31, 1  ;;  %vm374_vm13 = vcmp.eq.s32.totalorder %v904_v32, 1 }
  0xcf   :  { %v386_v23 = vsel %vm375_vm4, %v940_v59, 0.0  ;;  %v385_v5 = vsel %vm374_vm13, %v940_v59, 0.0 }
  0xd0   :  { %v393_v11 = vadd.f32 %v386_v23, %v332_v17  ;;  %v392_v26 = vadd.f32 %v385_v5, %v331_v13 }
  0xd1   :  { %v906_v33 = vpop.permute.xlu1 %365  ;;  %v908_v34 = vpop.permute.xlu0 %362 }
  0xd2   :  { %vm377_vm5 = vcmp.eq.s32.totalorder %v906_v33, 1  ;;  %vm376_vm6 = vcmp.eq.s32.totalorder %v908_v34, 1 }
  0xd3   :  { %v388_v10 = vsel %vm377_vm5, %v940_v59, 0.0  ;;  %v387_v6 = vsel %vm376_vm6, %v940_v59, 0.0 }
  0xd4   :  { %v395_v27 = vadd.f32 %v388_v10, %v334_v21  ;;  %v394_v32 = vadd.f32 %v387_v6, %v333_v9 }
  0xd5   :  { %v910_v35 = vpop.permute.xlu1 %371  ;;  %v912_v36 = vpop.permute.xlu0 %368 }
  0xd6   :  { %vm378_vm7 = vcmp.eq.s32.totalorder %v912_v36, 1  ;;  %vm379_vm0 = vcmp.eq.s32.totalorder %v910_v35, 1 }
  0xd7   :  { %v389_v12 = vsel %vm378_vm7, %v940_v59, 0.0  ;;  %v390_v57 = vsel %vm379_vm0, %v940_v59, 0.0 }
  0xd8   :  { %v396_v36 = vadd.f32 %v389_v12, %v335_v19  ;;  %v397_v13 = vadd.f32 %v390_v57, %v965_v0 }
  0xd9   :  { %v914_v37 = vpop.permute.xlu1 %417  ;;  %v916_v38 = vpop.permute.xlu0 %414 }
  0xda   :  { %vm435_vm8 = vcmp.eq.s32.totalorder %v914_v37, 1  ;;  %vm434_vm9 = vcmp.eq.s32.totalorder %v916_v38, 1 }
  0xdb   :  { %v446_v28 = vsel %vm435_vm8, %v961_v4, 0.0  ;;  %v445_v29 = vsel %vm434_vm9, %v961_v4, 0.0 }
  0xdd   :  { %v918_v39 = vpop.permute.xlu1 %423  ;;  %v920_v40 = vpop.permute.xlu0 %420 }
  0xde   :  { %vm437_vm10 = vcmp.eq.s32.totalorder %v918_v39, 1  ;;  %vm436_vm11 = vcmp.eq.s32.totalorder %v920_v40, 1  ;;  %v453_v39 = vadd.f32 %v446_v28, %v392_v26  ;;  %v452_v40 = vadd.f32 %v445_v29, %v391_v22 }
  0xdf   :  { %v448_v33 = vsel %vm437_vm10, %v961_v4, 0.0  ;;  %v447_v34 = vsel %vm436_vm11, %v961_v4, 0.0 }
  0xe0   :  { %v455_v42 = vadd.f32 %v448_v33, %v394_v32  ;;  %v454_v43 = vadd.f32 %v447_v34, %v393_v11 }
  0xe1   :  { %v925_v44 = vpop.permute.xlu1 %429  ;;  %v927_v45 = vpop.permute.xlu0 %426 }
  0xe2   :  { %vm439_vm15 = vcmp.eq.s32.totalorder %v925_v44, 1  ;;  %vm438_vm3 = vcmp.eq.s32.totalorder %v927_v45, 1 }
  0xe3   :  { %v450_v44 = vsel %vm439_vm15, %v961_v4, 0.0  ;;  %v449_v60 = vsel %vm438_vm3, %v961_v4, 0.0 }
  0xe4   :  { %v457_v58 = vadd.f32 %v450_v44, %v396_v36  ;;  %v456_v3 = vadd.f32 %v449_v60, %v395_v27 }
  0xe5   :  { %v932_v53 = vpop.permute.xlu1 %475  ;;  %v934_v54 = vpop.permute.xlu0 %432 }
  0xe6   :  { %vm495_vm12 = vcmp.eq.s32.totalorder %v932_v53, 1  ;;  %vm440_vm7 = vcmp.eq.s32.totalorder %v934_v54, 1 }
  0xe7   :  { %v506_v37 = vsel %vm495_vm12, %v974_v18, 0.0  ;;  %v451_v14 = vsel %vm440_vm7, %v961_v4, 0.0 }
  0xe8   :  { %v513_v48 = vadd.f32 %v506_v37, %v452_v40  ;;  %v458_v54 = vadd.f32 %v451_v14, %v397_v13 }
  0xe9   :  { %v945_v7 = vpop.permute.xlu1 %481  ;;  %v479_v8 = vpop.permute.xlu0 %478 }
  0xea   :  { %vm496_vm14 = vcmp.eq.s32.totalorder %v479_v8, 1  ;;  %vm497_vm1 = vcmp.eq.s32.totalorder %v945_v7, 1 }
  0xeb   :  { %v507_v38 = vsel %vm496_vm14, %v974_v18, 0.0  ;;  %v508_v50 = vsel %vm497_vm1, %v974_v18, 0.0 }
  0xec   :  { %v514_v49 = vadd.f32 %v507_v38, %v453_v39  ;;  %v515_v1 = vadd.f32 %v508_v50, %v454_v43 }
  0xed   :  { %v954_v24 = vpop.permute.xlu1 %487  ;;  %v485_v25 = vpop.permute.xlu0 %484 }
  0xee   :  { %vm498_vm2 = vcmp.eq.s32.totalorder %v485_v25, 1  ;;  %vm499_vm5 = vcmp.eq.s32.totalorder %v954_v24, 1 }
  0xef   :  { %v509_v51 = vsel %vm498_vm2, %v974_v18, 0.0  ;;  %v510_v35 = vsel %vm499_vm5, %v974_v18, 0.0 }
  0xf0   :  { %v516_v2 = vadd.f32 %v509_v51, %v455_v42  ;;  %v517_v9 = vadd.f32 %v510_v35, %v456_v3 }
  0xf1   :  { %v979_v30 = vpop.permute.xlu1 %493  ;;  %v491_v31 = vpop.permute.xlu0 %490 }
  0xf2   :  { %vm500_vm6 = vcmp.eq.s32.totalorder %v491_v31, 1  ;;  %vm501_vm10 = vcmp.eq.s32.totalorder %v979_v30, 1 }
  0xf3   :  { %v511_v45 = vsel %vm500_vm6, %v974_v18, 0.0  ;;  %v512_v19 = vsel %vm501_vm10, %v974_v18, 0.0 }
  0xf4   :  { %v518_v17 = vadd.f32 %v511_v45, %v457_v58  ;;  %v519_v25 = vadd.f32 %v512_v19, %v458_v54 }
  0xf5   :  { %v540_v46 = vpop.permute.xlu1 %539  ;;  %v537_v47 = vpop.permute.xlu0 %536 }
  0xf6   :  { %vm557_vm4 = vcmp.eq.s32.totalorder %v540_v46, 1  ;;  %vm556_vm13 = vcmp.eq.s32.totalorder %v537_v47, 1 }
  0xf7   :  { %v568_v52 = vsel %vm557_vm4, %v600_v41, 0.0  ;;  %v567_v53 = vsel %vm556_vm13, %v600_v41, 0.0 }
  0xf8   :  { %v575_v55 = vadd.f32 %v568_v52, %v514_v49  ;;  %v574_v56 = vadd.f32 %v567_v53, %v513_v48 }
  0xf9   :  { %v546_v61 = vpop.permute.xlu1 %545  ;;  %v543_v62 = vpop.permute.xlu0 %542 }
  0xfa   :  { %582 = vst [vmem:[%s1037_s2 + $0x8] sm:$0xff] %v575_v55  ;;  %581 = vst [vmem:[%s1037_s2] sm:$0xff] %v574_v56  ;;  %vm559_vm8 = vcmp.eq.s32.totalorder %v546_v61, 1  ;;  %vm558_vm9 = vcmp.eq.s32.totalorder %v543_v62, 1 }
  0xfb   :  { %v570_v59 = vsel %vm559_vm8, %v600_v41, 0.0  ;;  %v569_v63 = vsel %vm558_vm9, %v600_v41, 0.0 }
  0xfc   :  { %v577_v7 = vadd.f32 %v570_v59, %v516_v2  ;;  %v576_v8 = vadd.f32 %v569_v63, %v515_v1 }
  0xfd   :  { %v552_v15 = vpop.permute.xlu1 %551  ;;  %v549_v16 = vpop.permute.xlu0 %548 }
  0xfe   :  { %584 = vst [vmem:[%s1037_s2 + $0x18] sm:$0xff] %v577_v7  ;;  %583 = vst [vmem:[%s1037_s2 + $0x10] sm:$0xff] %v576_v8  ;;  %vm561_vm11 = vcmp.eq.s32.totalorder %v552_v15, 1  ;;  %vm560_vm12 = vcmp.eq.s32.totalorder %v549_v16, 1 }
  0xff   :  { %v572_v20 = vsel %vm561_vm11, %v600_v41, 0.0  ;;  %v571_v21 = vsel %vm560_vm12, %v600_v41, 0.0 }
 0x100   :  { %v579_v22 = vadd.f32 %v572_v20, %v518_v17  ;;  %v578_v23 = vadd.f32 %v571_v21, %v517_v9 }
 0x101   :  { %v555_v24 = vpop.permute.xlu0 %554 }
 0x102   :  { %586 = vst [vmem:[%s1037_s2 + $0x28] sm:$0xff] %v579_v22  ;;  %585 = vst [vmem:[%s1037_s2 + $0x20] sm:$0xff] %v578_v23  ;;  %vm562_vm14 = vcmp.eq.s32.totalorder %v555_v24, 1 }
 0x103   :  { %v573_v5 = vsel %vm562_vm14, %v600_v41, 0.0 }
 0x104   :  { %v580_v10 = vadd.f32 %v573_v5, %v519_v25 }
 0x106   :  { %587 = vst [vmem:[%s1037_s2 + $0x30] sm:$0xff] %v580_v10 }

</bundles_post_ra>
